<compile_context>
chip_gen: v7x
topology: tpu7x:2x2x1
jax: 0.10.0
libtpu: 0.0.40
codegen_flags: <defaults>
</compile_context>

<pallas_src>
import math
import numpy as np
import jax
import jax.numpy as jnp
from jax.experimental import pallas as pl
from jax.experimental.pallas import tpu as pltpu

# ---------------- deterministic synthetic SLAYER params ----------------
THETA   = 10.0      # neuron['theta']
TAU_SR  = 4.0       # neuron['tauSr']
TAU_REF = 1.0       # neuron['tauRef']
EPS_CUT = 0.01      # neuron['epsilon']
TS      = 1.0       # simulation['Ts']
T_STEPS = 8         # simulation['tSample'] / Ts
POOL    = 4         # self.slayer.pool(4)

LANE_CAP   = 65536  # max lanes per block (8 x 64K f32 out tile = 2 MiB)
MIN_BLOCKS = 2      # give both v7x TensorCores work


def _alpha_kernel(tau, mult, n, ts, eps_cut):
    """slayer._calculateAlphaKernel, truncated to the simulation window."""
    vals = []
    for i in range(n):
        t = i * ts
        v = mult * t / tau * math.exp(1.0 - t / tau)
        if abs(v) < eps_cut and t > tau:
            break
        vals.append(v)
    k = np.zeros((n,), np.float32)
    k[: len(vals)] = np.asarray(vals, np.float32)
    return k


SRM_KERNEL = _alpha_kernel(TAU_SR, 1.0, T_STEPS, TS, EPS_CUT)            # psp kernel
REF_KERNEL = _alpha_kernel(TAU_REF, -2.0 * THETA, T_STEPS, TS, EPS_CUT)  # refractory

# The in-kernel recurrence shortcut (spike at t only modifies strictly-future rows)
# relies on the refractory kernel being zero at lag 0.
assert REF_KERNEL[0] == 0.0, "REF_KERNEL[0] must be 0 for the recurrence shortcut"

# Causal FIR as a lower-triangular Toeplitz matrix.  The kernel input is the pooled
# spike COUNT (= pooled_spikes * Ts), so the Ts of psp and the 1/Ts spike amplitude
# cancel and only the 1.1*theta pool weight is folded in:
#   u[t] = sum_k FIR_MAT[t, k] * count[k]
FIR_MAT = np.zeros((T_STEPS, T_STEPS), np.float32)
for t in range(T_STEPS):
    for k in range(t + 1):
        FIR_MAT[t, k] = 1.1 * THETA * SRM_KERNEL[t - k]

# Refractory columns: REF_MAT[tt, t] = REF_KERNEL[tt - t] for tt >= t (else 0).
REF_MAT = np.zeros((T_STEPS, T_STEPS), np.float32)
for t in range(T_STEPS):
    for tt in range(t, T_STEPS):
        REF_MAT[tt, t] = REF_KERNEL[tt - t]


# ---------------------------- Pallas kernel ----------------------------
def sumpool_kernel(x_ref, fir_ref, ref_ref, out_ref):
    x = x_ref[...].astype(jnp.float32)   # (T, L) pooled spike counts (bf16 in HBM)
    fir = fir_ref[...]                   # (T, T) causal SRM Toeplitz * 1.1*theta
    refm = ref_ref[...]                  # (T, T) refractory columns

    # 1) Membrane potential u = fir @ counts, as T lane-wide broadcast FMAs on the
    #    VPU (exact f32; kernel is HBM-bound so the MXU would be idle anyway).
    u = fir[:, 0:1] * x[0:1, :]
    for k in range(1, T_STEPS):
        u = u + fir[:, k:k + 1] * x[k:k + 1, :]

    # 2) SLAYER spike generation: sequential over time, all in vregs.
    #    REF_KERNEL[0] == 0, so a spike at step t only modifies strictly-future rows;
    #    hence the final u's row t equals the membrane value thresholded at step t and
    #    one dense compare + store reproduces every per-step decision.
    for t in range(T_STEPS - 1):
        fired = (u[t:t + 1, :] >= THETA).astype(jnp.float32)   # (1, L)
        u = u + refm[:, t:t + 1] * fired                        # rows > t only
    out_ref[...] = ((u >= THETA).astype(jnp.float32) * (1.0 / TS)).astype(out_ref.dtype)


def _pick_lane_block(rp, cap=LANE_CAP, min_blocks=MIN_BLOCKS):
    """Largest lane-dense (multiple of 128) block <= cap, aiming for >= min_blocks blocks."""
    rp128 = pl.cdiv(rp, 128) * 128
    per = max(128, (rp128 // min_blocks) // 128 * 128)
    return min(cap, per)


def sum_pool_forward(x):
    """x: (N, C, H, W, T) float32 spike train (slayer NCHWT layout, amplitude 1/Ts)."""
    N, C, H, W, T = x.shape
    assert T == T_STEPS and H % POOL == 0 and W % POOL == 0
    Hp, Wp = H // POOL, W // POOL
    Rp = N * C * Hp * Wp

    # Build the pooled slab directly TIME-MAJOR so the transpose fuses into the
    # 4x4 pool reduction (one pass over the raw spike train).
    xt = jnp.moveaxis(x, -1, 0)                                   # (T, N, C, H, W)
    counts = (xt * TS).reshape(T, N, C, Hp, POOL, Wp, POOL).sum(axis=(4, 6))
    xp = counts.reshape(T, Rp)                                    # (T, Rp) time-major

    lane_block = _pick_lane_block(Rp)
    grid_n = max(MIN_BLOCKS, pl.cdiv(Rp, lane_block))
    Rp_pad = grid_n * lane_block

    # Pad lanes with zeros (zero counts -> u = 0 < theta -> no spike) and halve the
    # streamed bytes: integer counts 0..16 are exact in bf16.
    xp = jnp.pad(xp, ((0, 0), (0, Rp_pad - Rp))).astype(jnp.bfloat16)

    fir = jnp.asarray(FIR_MAT)    # (T, T) f32
    refm = jnp.asarray(REF_MAT)   # (T, T) f32

    out = pl.pallas_call(
        sumpool_kernel,
        out_shape=jax.ShapeDtypeStruct((T, Rp_pad), jnp.float32),
        grid=(grid_n,),
        in_specs=[
            pl.BlockSpec((T, lane_block), lambda i: (0, i)),          # pooled counts (bf16)
            pl.BlockSpec((T_STEPS, T_STEPS), lambda i: (0, 0)),       # FIR matrix
            pl.BlockSpec((T_STEPS, T_STEPS), lambda i: (0, 0)),       # refractory matrix
        ],
        out_specs=pl.BlockSpec((T, lane_block), lambda i: (0, i)),
        compiler_params=pltpu.CompilerParams(
            dimension_semantics=("parallel",)),
    )(xp, fir, refm)

    out = out[:, :Rp].reshape(T, N, C, Hp, Wp)
    # Module contract returns NCHWT, so the post-kernel transpose stays.
    return jnp.transpose(out, (1, 2, 3, 4, 0))                       # (N, C, Hp, Wp, T)


# ------------------------- pure NumPy reference -------------------------
def reference(x):
    x = np.asarray(x, np.float32)
    N, C, H, W, T = x.shape
    # psp: causal conv with SRM kernel
    psp = np.zeros_like(x)
    for t in range(T):
        for k in range(t + 1):
            psp[..., t] += SRM_KERNEL[k] * x[..., t - k]
    psp *= TS
    # 4x4 sum pool, weight 1.1*theta
    Hp, Wp = H // POOL, W // POOL
    u = np.zeros((N, C, Hp, Wp, T), np.float32)
    for i in range(Hp):
        for j in range(Wp):
            u[:, :, i, j, :] = 1.1 * THETA * psp[
                :, :, POOL * i:POOL * (i + 1), POOL * j:POOL * (j + 1), :
            ].sum(axis=(2, 3))
    # SLAYER spikes with refractory response
    s = np.zeros_like(u)
    for t in range(T):
        fired = (u[..., t] >= THETA).astype(np.float32)
        s[..., t] = fired * (1.0 / TS)
        for j in range(T_STEPS):
            if t + j < T:
                u[..., t + j] += REF_KERNEL[j] * fired
    return s


if __name__ == "__main__":
    key = jax.random.PRNGKey(0)
    N, C, H, W = 2, 4, 16, 16
    # binary input spike train, amplitude 1/Ts
    x = jax.random.bernoulli(key, 0.25, (N, C, H, W, T_STEPS)).astype(jnp.float32)
    x = x * (1.0 / TS)

    y = sum_pool_forward(x)
    y = jax.block_until_ready(y)

    y_ref = reference(np.asarray(x))
    # pool-first changes f.p. summation order slightly -> atol 1e-4
    np.testing.assert_allclose(np.asarray(y), y_ref, atol=1e-4)
    print("KERNEL_OK")
</pallas_src>

<mosaic_0001>
module attributes {stable_mosaic.version = 11 : i64} {
  func.func @sumpool_kernel(%arg0: i32, %arg1: memref<8x128xbf16, #tpu.memory_space<vmem>>, %arg2: memref<8x8xf32, #tpu.memory_space<vmem>>, %arg3: memref<8x8xf32, #tpu.memory_space<vmem>>, %arg4: memref<8x128xf32, #tpu.memory_space<vmem>>) attributes {dimension_semantics = [#tpu.dimension_semantics<parallel>], iteration_bounds = array<i64: 2>, scalar_prefetch = 0 : i64, scratch_operands = 0 : i64, tpu.core_type = #tpu.core_type<tc>, window_params = [{transform_indices = @transform_0, window_bounds = array<i64: 8, 128>}, {pipeline_mode = #tpu.pipeline_mode<synchronous>, transform_indices = @transform_1, window_bounds = array<i64: 8, 8>}, {pipeline_mode = #tpu.pipeline_mode<synchronous>, transform_indices = @transform_2, window_bounds = array<i64: 8, 8>}, {transform_indices = @transform_3, window_bounds = array<i64: 8, 128>}]} {
    %c0 = arith.constant 0 : index
    %c0_0 = arith.constant 0 : index
    %0 = vector.load %arg1[%c0, %c0_0] : memref<8x128xbf16, #tpu.memory_space<vmem>>, vector<8x128xbf16>
    %1 = arith.extf %0 : vector<8x128xbf16> to vector<8x128xf32>
    %c0_1 = arith.constant 0 : index
    %c0_2 = arith.constant 0 : index
    %2 = vector.load %arg2[%c0_1, %c0_2] : memref<8x8xf32, #tpu.memory_space<vmem>>, vector<8x8xf32>
    %c0_3 = arith.constant 0 : index
    %c0_4 = arith.constant 0 : index
    %3 = vector.load %arg3[%c0_3, %c0_4] : memref<8x8xf32, #tpu.memory_space<vmem>>, vector<8x8xf32>
    %4 = vector.extract_strided_slice %2 {offsets = [0, 0], sizes = [8, 1], strides = [1, 1]} : vector<8x8xf32> to vector<8x1xf32>
    %5 = vector.extract_strided_slice %1 {offsets = [0, 0], sizes = [1, 128], strides = [1, 1]} : vector<8x128xf32> to vector<1x128xf32>
    %6 = vector.broadcast %4 : vector<8x1xf32> to vector<8x128xf32>
    %7 = vector.broadcast %5 : vector<1x128xf32> to vector<8x128xf32>
    %8 = arith.mulf %6, %7 : vector<8x128xf32>
    %9 = vector.extract_strided_slice %2 {offsets = [0, 1], sizes = [8, 1], strides = [1, 1]} : vector<8x8xf32> to vector<8x1xf32>
    %10 = vector.extract_strided_slice %1 {offsets = [1, 0], sizes = [1, 128], strides = [1, 1]} : vector<8x128xf32> to vector<1x128xf32>
    %11 = vector.broadcast %9 : vector<8x1xf32> to vector<8x128xf32>
    %12 = vector.broadcast %10 : vector<1x128xf32> to vector<8x128xf32>
    %13 = arith.mulf %11, %12 : vector<8x128xf32>
    %14 = arith.addf %8, %13 : vector<8x128xf32>
    %15 = vector.extract_strided_slice %2 {offsets = [0, 2], sizes = [8, 1], strides = [1, 1]} : vector<8x8xf32> to vector<8x1xf32>
    %16 = vector.extract_strided_slice %1 {offsets = [2, 0], sizes = [1, 128], strides = [1, 1]} : vector<8x128xf32> to vector<1x128xf32>
    %17 = vector.broadcast %15 : vector<8x1xf32> to vector<8x128xf32>
    %18 = vector.broadcast %16 : vector<1x128xf32> to vector<8x128xf32>
    %19 = arith.mulf %17, %18 : vector<8x128xf32>
    %20 = arith.addf %14, %19 : vector<8x128xf32>
    %21 = vector.extract_strided_slice %2 {offsets = [0, 3], sizes = [8, 1], strides = [1, 1]} : vector<8x8xf32> to vector<8x1xf32>
    %22 = vector.extract_strided_slice %1 {offsets = [3, 0], sizes = [1, 128], strides = [1, 1]} : vector<8x128xf32> to vector<1x128xf32>
    %23 = vector.broadcast %21 : vector<8x1xf32> to vector<8x128xf32>
    %24 = vector.broadcast %22 : vector<1x128xf32> to vector<8x128xf32>
    %25 = arith.mulf %23, %24 : vector<8x128xf32>
    %26 = arith.addf %20, %25 : vector<8x128xf32>
    %27 = vector.extract_strided_slice %2 {offsets = [0, 4], sizes = [8, 1], strides = [1, 1]} : vector<8x8xf32> to vector<8x1xf32>
    %28 = vector.extract_strided_slice %1 {offsets = [4, 0], sizes = [1, 128], strides = [1, 1]} : vector<8x128xf32> to vector<1x128xf32>
    %29 = vector.broadcast %27 : vector<8x1xf32> to vector<8x128xf32>
    %30 = vector.broadcast %28 : vector<1x128xf32> to vector<8x128xf32>
    %31 = arith.mulf %29, %30 : vector<8x128xf32>
    %32 = arith.addf %26, %31 : vector<8x128xf32>
    %33 = vector.extract_strided_slice %2 {offsets = [0, 5], sizes = [8, 1], strides = [1, 1]} : vector<8x8xf32> to vector<8x1xf32>
    %34 = vector.extract_strided_slice %1 {offsets = [5, 0], sizes = [1, 128], strides = [1, 1]} : vector<8x128xf32> to vector<1x128xf32>
    %35 = vector.broadcast %33 : vector<8x1xf32> to vector<8x128xf32>
    %36 = vector.broadcast %34 : vector<1x128xf32> to vector<8x128xf32>
    %37 = arith.mulf %35, %36 : vector<8x128xf32>
    %38 = arith.addf %32, %37 : vector<8x128xf32>
    %39 = vector.extract_strided_slice %2 {offsets = [0, 6], sizes = [8, 1], strides = [1, 1]} : vector<8x8xf32> to vector<8x1xf32>
    %40 = vector.extract_strided_slice %1 {offsets = [6, 0], sizes = [1, 128], strides = [1, 1]} : vector<8x128xf32> to vector<1x128xf32>
    %41 = vector.broadcast %39 : vector<8x1xf32> to vector<8x128xf32>
    %42 = vector.broadcast %40 : vector<1x128xf32> to vector<8x128xf32>
    %43 = arith.mulf %41, %42 : vector<8x128xf32>
    %44 = arith.addf %38, %43 : vector<8x128xf32>
    %45 = vector.extract_strided_slice %2 {offsets = [0, 7], sizes = [8, 1], strides = [1, 1]} : vector<8x8xf32> to vector<8x1xf32>
    %46 = vector.extract_strided_slice %1 {offsets = [7, 0], sizes = [1, 128], strides = [1, 1]} : vector<8x128xf32> to vector<1x128xf32>
    %47 = vector.broadcast %45 : vector<8x1xf32> to vector<8x128xf32>
    %48 = vector.broadcast %46 : vector<1x128xf32> to vector<8x128xf32>
    %49 = arith.mulf %47, %48 : vector<8x128xf32>
    %50 = arith.addf %44, %49 : vector<8x128xf32>
    %51 = vector.extract_strided_slice %50 {offsets = [0, 0], sizes = [1, 128], strides = [1, 1]} : vector<8x128xf32> to vector<1x128xf32>
    %cst = arith.constant 1.000000e+01 : f32
    %52 = vector.broadcast %cst : f32 to vector<1x128xf32>
    %53 = arith.cmpf oge, %51, %52 : vector<1x128xf32>
    %54 = arith.extui %53 : vector<1x128xi1> to vector<1x128xi32>
    %55 = arith.sitofp %54 : vector<1x128xi32> to vector<1x128xf32>
    %56 = vector.extract_strided_slice %3 {offsets = [0, 0], sizes = [8, 1], strides = [1, 1]} : vector<8x8xf32> to vector<8x1xf32>
    %57 = vector.broadcast %56 : vector<8x1xf32> to vector<8x128xf32>
    %58 = vector.broadcast %55 : vector<1x128xf32> to vector<8x128xf32>
    %59 = arith.mulf %57, %58 : vector<8x128xf32>
    %60 = arith.addf %50, %59 : vector<8x128xf32>
    %61 = vector.extract_strided_slice %60 {offsets = [1, 0], sizes = [1, 128], strides = [1, 1]} : vector<8x128xf32> to vector<1x128xf32>
    %cst_5 = arith.constant 1.000000e+01 : f32
    %62 = vector.broadcast %cst_5 : f32 to vector<1x128xf32>
    %63 = arith.cmpf oge, %61, %62 : vector<1x128xf32>
    %64 = arith.extui %63 : vector<1x128xi1> to vector<1x128xi32>
    %65 = arith.sitofp %64 : vector<1x128xi32> to vector<1x128xf32>
    %66 = vector.extract_strided_slice %3 {offsets = [0, 1], sizes = [8, 1], strides = [1, 1]} : vector<8x8xf32> to vector<8x1xf32>
    %67 = vector.broadcast %66 : vector<8x1xf32> to vector<8x128xf32>
    %68 = vector.broadcast %65 : vector<1x128xf32> to vector<8x128xf32>
    %69 = arith.mulf %67, %68 : vector<8x128xf32>
    %70 = arith.addf %60, %69 : vector<8x128xf32>
    %71 = vector.extract_strided_slice %70 {offsets = [2, 0], sizes = [1, 128], strides = [1, 1]} : vector<8x128xf32> to vector<1x128xf32>
    %cst_6 = arith.constant 1.000000e+01 : f32
    %72 = vector.broadcast %cst_6 : f32 to vector<1x128xf32>
    %73 = arith.cmpf oge, %71, %72 : vector<1x128xf32>
    %74 = arith.extui %73 : vector<1x128xi1> to vector<1x128xi32>
    %75 = arith.sitofp %74 : vector<1x128xi32> to vector<1x128xf32>
    %76 = vector.extract_strided_slice %3 {offsets = [0, 2], sizes = [8, 1], strides = [1, 1]} : vector<8x8xf32> to vector<8x1xf32>
    %77 = vector.broadcast %76 : vector<8x1xf32> to vector<8x128xf32>
    %78 = vector.broadcast %75 : vector<1x128xf32> to vector<8x128xf32>
    %79 = arith.mulf %77, %78 : vector<8x128xf32>
    %80 = arith.addf %70, %79 : vector<8x128xf32>
    %81 = vector.extract_strided_slice %80 {offsets = [3, 0], sizes = [1, 128], strides = [1, 1]} : vector<8x128xf32> to vector<1x128xf32>
    %cst_7 = arith.constant 1.000000e+01 : f32
    %82 = vector.broadcast %cst_7 : f32 to vector<1x128xf32>
    %83 = arith.cmpf oge, %81, %82 : vector<1x128xf32>
    %84 = arith.extui %83 : vector<1x128xi1> to vector<1x128xi32>
    %85 = arith.sitofp %84 : vector<1x128xi32> to vector<1x128xf32>
    %86 = vector.extract_strided_slice %3 {offsets = [0, 3], sizes = [8, 1], strides = [1, 1]} : vector<8x8xf32> to vector<8x1xf32>
    %87 = vector.broadcast %86 : vector<8x1xf32> to vector<8x128xf32>
    %88 = vector.broadcast %85 : vector<1x128xf32> to vector<8x128xf32>
    %89 = arith.mulf %87, %88 : vector<8x128xf32>
    %90 = arith.addf %80, %89 : vector<8x128xf32>
    %91 = vector.extract_strided_slice %90 {offsets = [4, 0], sizes = [1, 128], strides = [1, 1]} : vector<8x128xf32> to vector<1x128xf32>
    %cst_8 = arith.constant 1.000000e+01 : f32
    %92 = vector.broadcast %cst_8 : f32 to vector<1x128xf32>
    %93 = arith.cmpf oge, %91, %92 : vector<1x128xf32>
    %94 = arith.extui %93 : vector<1x128xi1> to vector<1x128xi32>
    %95 = arith.sitofp %94 : vector<1x128xi32> to vector<1x128xf32>
    %96 = vector.extract_strided_slice %3 {offsets = [0, 4], sizes = [8, 1], strides = [1, 1]} : vector<8x8xf32> to vector<8x1xf32>
    %97 = vector.broadcast %96 : vector<8x1xf32> to vector<8x128xf32>
    %98 = vector.broadcast %95 : vector<1x128xf32> to vector<8x128xf32>
    %99 = arith.mulf %97, %98 : vector<8x128xf32>
    %100 = arith.addf %90, %99 : vector<8x128xf32>
    %101 = vector.extract_strided_slice %100 {offsets = [5, 0], sizes = [1, 128], strides = [1, 1]} : vector<8x128xf32> to vector<1x128xf32>
    %cst_9 = arith.constant 1.000000e+01 : f32
    %102 = vector.broadcast %cst_9 : f32 to vector<1x128xf32>
    %103 = arith.cmpf oge, %101, %102 : vector<1x128xf32>
    %104 = arith.extui %103 : vector<1x128xi1> to vector<1x128xi32>
    %105 = arith.sitofp %104 : vector<1x128xi32> to vector<1x128xf32>
    %106 = vector.extract_strided_slice %3 {offsets = [0, 5], sizes = [8, 1], strides = [1, 1]} : vector<8x8xf32> to vector<8x1xf32>
    %107 = vector.broadcast %106 : vector<8x1xf32> to vector<8x128xf32>
    %108 = vector.broadcast %105 : vector<1x128xf32> to vector<8x128xf32>
    %109 = arith.mulf %107, %108 : vector<8x128xf32>
    %110 = arith.addf %100, %109 : vector<8x128xf32>
    %111 = vector.extract_strided_slice %110 {offsets = [6, 0], sizes = [1, 128], strides = [1, 1]} : vector<8x128xf32> to vector<1x128xf32>
    %cst_10 = arith.constant 1.000000e+01 : f32
    %112 = vector.broadcast %cst_10 : f32 to vector<1x128xf32>
    %113 = arith.cmpf oge, %111, %112 : vector<1x128xf32>
    %114 = arith.extui %113 : vector<1x128xi1> to vector<1x128xi32>
    %115 = arith.sitofp %114 : vector<1x128xi32> to vector<1x128xf32>
    %116 = vector.extract_strided_slice %3 {offsets = [0, 6], sizes = [8, 1], strides = [1, 1]} : vector<8x8xf32> to vector<8x1xf32>
    %117 = vector.broadcast %116 : vector<8x1xf32> to vector<8x128xf32>
    %118 = vector.broadcast %115 : vector<1x128xf32> to vector<8x128xf32>
    %119 = arith.mulf %117, %118 : vector<8x128xf32>
    %120 = arith.addf %110, %119 : vector<8x128xf32>
    %cst_11 = arith.constant 1.000000e+01 : f32
    %121 = vector.broadcast %cst_11 : f32 to vector<8x128xf32>
    %122 = arith.cmpf oge, %120, %121 : vector<8x128xf32>
    %123 = arith.extui %122 : vector<8x128xi1> to vector<8x128xi32>
    %124 = arith.sitofp %123 : vector<8x128xi32> to vector<8x128xf32>
    %cst_12 = arith.constant 1.000000e+00 : f32
    %125 = vector.broadcast %cst_12 : f32 to vector<8x128xf32>
    %126 = arith.mulf %124, %125 : vector<8x128xf32>
    %c0_13 = arith.constant 0 : index
    %c0_14 = arith.constant 0 : index
    %127 = vector.load %arg4[%c0_13, %c0_14] : memref<8x128xf32, #tpu.memory_space<vmem>>, vector<8x128xf32>
    tpu.vector_store %arg4[%c0_13, %c0_14], %126 {strides = array<i32>} : memref<8x128xf32, #tpu.memory_space<vmem>>, vector<8x128xf32>,
    return
  }
  func.func @transform_0(%arg0: i32) -> (i32, i32) {
    %c0_i32 = arith.constant 0 : i32
    %c0_i32_0 = arith.constant 0 : i32
    return %c0_i32, %arg0 : i32, i32
  }
  func.func @transform_1(%arg0: i32) -> (i32, i32) {
    %c0_i32 = arith.constant 0 : i32
    %c0_i32_0 = arith.constant 0 : i32
    %c0_i32_1 = arith.constant 0 : i32
    return %c0_i32, %c0_i32_0 : i32, i32
  }
  func.func @transform_2(%arg0: i32) -> (i32, i32) {
    %c0_i32 = arith.constant 0 : i32
    %c0_i32_0 = arith.constant 0 : i32
    %c0_i32_1 = arith.constant 0 : i32
    return %c0_i32, %c0_i32_0 : i32, i32
  }
  func.func @transform_3(%arg0: i32) -> (i32, i32) {
    %c0_i32 = arith.constant 0 : i32
    %c0_i32_0 = arith.constant 0 : i32
    return %c0_i32, %arg0 : i32, i32
  }
}

</mosaic_0001>

<bundles_post_ra>
// kernel: tpu_custom_call.1
= control target key start
LH: loop header
LB: loop body
LE: loop exit
PB: predicated region body
PF: predicated region fallthrough
CT: control target
= control target key end

     0   :  { %8 = vsyncpa [#allocation3], 0  ;;  %s1039_s0 = inlined_call_operand.hbm [shape: bf16[8,256], index: 0, kind: input, shape index: {}]   ;;  %s1040_s1 = inlined_call_operand.hbm [shape: f32[8,8], index: 1, kind: input, shape index: {}]   ;;  %s1041_s2 = inlined_call_operand.hbm [shape: f32[8,8], index: 2, kind: input, shape index: {}]   ;;  %s1042_s3 = inlined_call_operand.hbm [shape: f32[8,256], index: 3, kind: output, shape index: {}]  }
   0x1   :  { %10 = vsyncpa [#allocation3 + $0x1], 0 }
   0x2   :  { %11 = vsyncpa [#allocation6], 0 }
   0x3   :  { %12 = vsyncpa [#allocation4], 0 }
   0x4   :  { %14 = vsyncpa [#allocation4 + $0x1], 0  ;;  %s800_s12 = smov 0   ;;  %s802_s13 = smov 0  }
   0x5   :  { %s804_s14 = smov 0   ;;  %s806_s15 = smov 0  }
   0x6 LB: > { %s821_s16 = sadd.s32 4294967295, %s765_s15   ;;  %s494_s17 = sadd.s32 4294967294, %s765_s15   ;;  %s765_s15 = sphi %s806_s15, %s1062_s15   ;;  %s761_s14 = sphi %s804_s14, %s1061_s14   ;;  %s757_s13 = sphi %s802_s13, %s1060_s13   ;;  %s753_s12 = sphi %s800_s12, %s1059_s12  }
   0x7   : > { %p40_p0 = scmp.ne.s32.totalorder %s757_s13, %s753_s12  ;;  %p1043_p1 = scmp.eq.s32.totalorder %s821_s16, 0 }
   0x8   : > { %p112_p3 = scmp.eq.s32.totalorder %s494_s17, 1  ;;  %p495_p5 = scmp.ge.s32.totalorder %s765_s15, 1 }
   0x9   : > { %p830_p4 = por %p1043_p1, %p40_p0  ;;  %p119_p7 = scmp.lt.s32.totalorder %s765_s15, 3 }
   0xa   : > { %p835_p6 = por %p112_p3, %p40_p0  ;;  %s767_s21 = smov [#allocation5]  }
   0xb   : > { %s1046_s18 = scalar_select %p830_p4, 1, 0 }
   0xc   : > { %s1047_s19 = scalar_select %p835_p6, 1, 0 }
   0xd   : > { %p840_p8 = pnand %p495_p5, %p119_p7  ;;  %s132_s22 = sshll.u32 %s767_s21, 4  ;;  %s133_s22 = int_to_ptr.vmem [resolvable:$true] %s132_s22 }
   0xe   : > { %s768_s23 = smov [#allocation7]   ;;  %s856_s26 = sadd.s32 1, %s765_s15  }
   0xf   : > { %s1048_s20 = scalar_select %p840_p8, 1, 0 }
  0x10   : > { %p530_p10 = pneg %p840_p8  ;;  %s143_s24 = sshll.u32 %s768_s23, 4  ;;  %s853_s24 = int_to_ptr.vmem [resolvable:$true] %s143_s24 }
  0x11   : > { %s24_s27 = ssub.s32 %s765_s15, %s856_s26  ;;  %s609_s30 = scalar_lea.hbm %s1040_s1, 128 }
  0x12   : > { %p849_p11 = pnand %p530_p10, %p1043_p1  ;;  %p610_p12 = scmp.ne.s32.totalorder %s1040_s1, %s609_s30 }
  0x13   : > { %p616_p5 = scmp.lt.u32.totalorder %s609_s30, %s1040_s1 }
  0x14   : > { %p611_p13 = pneg %p849_p11 }
  0x16   : > { %p612_p0 = pnand %p611_p13, %p610_p12 }
  0x18   : > { %p613_p3 = pneg %p612_p0 }
  0x1a   : > { %p618_p7 = pnand %p616_p5, %p613_p3 }
  0x1c   : > { %621 = shalt.err (!%p618_p7)
}
  0x1d   : > { %s622_s8 = scalar_lea.vmem %s133_s22, 128  ;;  %p630_p2 = scmp.lt.s32.totalorder %s133_s22, %s133_s22 }
  0x1e   : > { %p623_p10 = scmp.ne.s32.totalorder %s133_s22, %s622_s8  ;;  %p631_p6 = scmp.lt.s32.totalorder %s622_s8, %s622_s8 }
  0x20   : > { %p625_p9 = pnand %p623_p10, %p611_p13  ;;  %p632_p4 = por %p631_p6, %p630_p2 }
  0x22   : > { %p626_p1 = pneg %p625_p9 }
  0x24   : > { %p633_p8 = pnand %p632_p4, %p626_p1 }
  0x26   : > { %636 = shalt.err (!%p633_p8)
}
  0x27   : > { %533 = dma.hbm_to_vmem [thread:$0]  (!%p849_p11), %s1040_s1, 128, %s133_s22, [#allocation6]  }
  0x28   : > { %s637_s21 = scalar_lea.hbm %s1041_s2, 128 }
  0x29   : > { %p638_p9 = scmp.ne.s32.totalorder %s1041_s2, %s637_s21  ;;  %p644_p4 = scmp.lt.u32.totalorder %s637_s21, %s1041_s2 }
  0x2b   : > { %p640_p2 = pnand %p638_p9, %p611_p13 }
  0x2d   : > { %p641_p1 = pneg %p640_p2 }
  0x2f   : > { %p646_p6 = pnand %p644_p4, %p641_p1 }
  0x31   : > { %649 = shalt.err (!%p646_p6)
}
  0x32   : > { %s650_s22 = scalar_lea.vmem %s853_s24, 128  ;;  %p658_p3 = scmp.lt.s32.totalorder %s853_s24, %s853_s24 }
  0x33   : > { %p651_p8 = scmp.ne.s32.totalorder %s853_s24, %s650_s22  ;;  %p659_p5 = scmp.lt.s32.totalorder %s650_s22, %s650_s22 }
  0x35   : > { %p653_p12 = pnand %p651_p8, %p611_p13  ;;  %p660_p7 = por %p659_p5, %p658_p3 }
  0x37   : > { %p654_p0 = pneg %p653_p12 }
  0x39   : > { %p661_p10 = pnand %p660_p7, %p654_p0 }
  0x3b   : > { %664 = shalt.err (!%p661_p10)
}
  0x3c   : > { %536 = dma.hbm_to_vmem [thread:$0]  (!%p849_p11), %s1041_s2, 128, %s853_s24, [#allocation6]  }
  0x3d   : > { %p25_p13 = scmp.eq.s32.totalorder %s24_s27, 0  ;;  %s27_s6 = sadd.s32 1, %s761_s14 }
  0x3e   : > { %p34_p9 = scmp.ne.s32.totalorder %s761_s14, %s757_s13  ;;  %p35_p2 = scmp.eq.s32.totalorder %s765_s15, 0 }
  0x3f   : > { %s915_s25 = scalar_select %p25_p13, %s761_s14, %s27_s6  }
  0x40   : > { %p36_p1 = por %p35_p2, %p34_p9  ;;  %p1050_p4 = scmp.eq.s32.totalorder %s821_s16, 1 }
  0x41   : > { %p547_p8 = scmp.lt.s32.totalorder %s765_s15, 2  ;;  %s154_s8 = sand.u32 1, %s761_s14  }
  0x42   : > { %p919_p6 = por %p1050_p4, %p34_p9  ;;  %s499_s9 = sshll.u32 %s154_s8, 2 }
  0x43   : > { %s500_s10 = sshll.u32 %s765_s15, 6  ;;  %s158_s27 = scalar_lea.vmem [#allocation2], %s499_s9 }
  0x44   : > { %s929_s24 = scalar_lea.hbm %s1039_s0, %s500_s10  ;;  %s165_s21 = sshll.u32 %s158_s27, 4  ;;  %s931_s21 = int_to_ptr.vmem [resolvable:$true] %s165_s21 }
  0x45   : > { %p933_p11 = pnand %p547_p8, %p36_p1  ;;  %s155_s28 = scalar_lea.sflag [#allocation3], %s154_s8 }
  0x46   : > { %s665_s29 = scalar_lea.hbm %s929_s24, 64  ;;  %s670_s4 = scalar_lea.hbm %s1039_s0, 128 }
  0x47   : > { %p666_p12 = scmp.ne.s32.totalorder %s929_s24, %s665_s29  ;;  %p667_p0 = pneg %p933_p11 }
  0x48   : > { %p671_p7 = scmp.lt.u32.totalorder %s929_s24, %s1039_s0  ;;  %p672_p10 = scmp.lt.u32.totalorder %s670_s4, %s665_s29 }
  0x49   : > { %p668_p3 = pnand %p667_p0, %p666_p12  ;;  %p674_p9 = scmp.lt.u32.totalorder %s665_s29, %s929_s24 }
  0x4a   : > { %p673_p13 = por %p672_p10, %p671_p7 }
  0x4b   : > { %p669_p5 = pneg %p668_p3 }
  0x4c   : > { %p675_p2 = por %p674_p9, %p673_p13 }
  0x4e   : > { %p676_p1 = pnand %p675_p2, %p669_p5 }
  0x50   : > { %679 = shalt.err (!%p676_p1)
}
  0x51   : > { %s680_s8 = scalar_lea.vmem %s931_s21, 64  ;;  %s769_s9 = smov [#allocation2]  }
  0x52   : > { %p681_p4 = scmp.ne.s32.totalorder %s931_s21, %s680_s8  ;;  %s685_s10 = sshll.u32 %s769_s9, 4  ;;  %s686_s10 = int_to_ptr.vmem [resolvable:$false] %s685_s10 }
  0x53   : > { %s687_s11 = scalar_lea.vmem %s686_s10, 128  ;;  %p688_p3 = scmp.lt.s32.totalorder %s931_s21, %s686_s10 }
  0x54   : > { %p683_p8 = pnand %p681_p4, %p667_p0  ;;  %p689_p7 = scmp.lt.s32.totalorder %s687_s11, %s680_s8 }
  0x56   : > { %p684_p12 = pneg %p683_p8  ;;  %p690_p10 = por %p689_p7, %p688_p3 }
  0x58   : > { %p691_p13 = pnand %p690_p10, %p684_p12 }
  0x5a   : > { %694 = shalt.err (!%p691_p13)
}
  0x5b   : > { %540 = dma.hbm_to_vmem [thread:$0]  (!%p933_p11), %s929_s24, 64, %s931_s21, %s155_s28  }
  0x5c   : > { %p1053_p5 = scmp.ne.s32.totalorder %s1048_s20, 0 }
  0x5d   : > { %s965_s17 = sand.u32 (!%p1053_p5), 1, %s757_s13   ;;  %p1054_p0 = scmp.ne.s32.totalorder (!%p1053_p5), %s1046_s18, 0 }
  0x5e   : > { %174 = sbr.rel (%p1053_p5) target bundleno = 331 (0x14b), region = 32  ;;  %s502_s27 = sshll.u32 (!%p1053_p5), %s965_s17, 2 }
  0x5f   : > { %s177_s29 = scalar_lea.sflag (!%p1053_p5), [#allocation3], %s965_s17  ;;  %s969_s30 = scalar_lea.vmem (!%p1053_p5), [#allocation2], %s502_s27 }
  0x65   : > { %740 = dma.done.wait (%p1054_p0), %s177_s29, 64  }
  0x66   : > { %742 = vsyncadd (%p1054_p0), %s177_s29, 4294967232  ;;  %p1055_p11 = scmp.eq.s32.totalorder %s821_s16, 0 }
  0x68   : > { %744 = dma.done.wait (%p1055_p11), [#allocation6], 256   ;;  %p1056_p9 = pmov %p1055_p11 }
  0x69   : > { %v770_v0 = vmov 2   ;;  %v771_v1 = vmov 0   ;;  %v213_v2 = vld [vmem:[#allocation5] sm:$0xff]  ;;  %v772_v3 = vmov 3   ;;  %v773_v4 = vmov 1   ;;  %v214_v7 = vld [vmem:[#allocation7] sm:$0xff] }
  0x6a   : > { %746 = vsyncadd (%p1056_p9), [#allocation6], 4294967040  ;;  %596 = vset.pattern.permute.xlu1 %v770_v0  ;;  %594 = vset.pattern.permute.xlu0 %v771_v1  ;;  %v774_v5 = vmov 4   ;;  %v775_v6 = vmov 5   ;;  %v776_v8 = vmov 6   ;;  %v777_v9 = vmov 7  }
  0x6b   : > { %236 = vperm.xlu1 %596, %v213_v2   ;;  %217 = vperm.xlu0 %594, %v213_v2   ;;  %v220_v10 = vlaneseq  ;;  %v211_v12 = vld [vmem:[%s969_s30] sm:$0xf]  ;;  %v778_v54 = vmov 0.0   ;;  %s505_s18 = sshll.u32 %s965_s17, 3  ;;  %s515_s20 = sshll.u32 %s821_s16, 7 }
  0x6c   : > { %v212_v17 = vunpack.c.l.bf16 %v211_v12  ;;  %s210_s24 = scalar_lea.vmem [#allocation8], %s505_s18  ;;  %s995_s22 = scalar_lea.hbm %s1042_s3, %s515_s20 }
  0x6d   : > { %v979_v11 = vshrl.u32 %v220_v10, 7  ;;  %s405_s21 = sshll.u32 %s210_s24, 4  ;;  %s392_s4 = scalar_lea.sflag [#allocation4], %s965_s17  ;;  %s997_s21 = int_to_ptr.vmem [resolvable:$true] %s405_s21 }
  0x6e   : > { %s695_s5 = scalar_lea.vmem %s997_s21, 128  ;;  %s779_s16 = smov [#allocation8]  }
  0x6f   : > { %597 = vset.pattern.permute.xlu1 %v772_v3  ;;  %595 = vset.pattern.permute.xlu0 %v773_v4  ;;  %v222_v13 = vsub.s32 0, %v979_v11  ;;  %v231_v14 = vsub.s32 1, %v979_v11  ;;  %v241_v15 = vsub.s32 2, %v979_v11  ;;  %v251_v20 = vsub.s32 3, %v979_v11  ;;  %p696_p2 = scmp.ne.s32.totalorder %s997_s21, %s695_s5  ;;  %s699_s6 = sshll.u32 %s779_s16, 4  ;;  %s700_s6 = int_to_ptr.vmem [resolvable:$false] %s699_s6 }
  0x70   : > { %246 = vperm.xlu1 %597, %v213_v2   ;;  %226 = vperm.xlu0 %595, %v213_v2   ;;  %v261_v22 = vsub.s32 4, %v979_v11  ;;  %v271_v26 = vsub.s32 5, %v979_v11  ;;  %v281_v34 = vsub.s32 6, %v979_v11  ;;  %v291_v43 = vsub.s32 7, %v979_v11  ;;  %s701_s8 = scalar_lea.vmem %s700_s6, 256  ;;  %p702_p8 = scmp.lt.s32.totalorder %s997_s21, %s700_s6 }
  0x71   : > { %v223_v19 = vrot.slane %v212_v17, %v222_v13  ;;  %v232_v21 = vrot.slane %v212_v17, %v231_v14  ;;  %v242_v23 = vrot.slane %v212_v17, %v241_v15  ;;  %v252_v28 = vrot.slane %v212_v17, %v251_v20  ;;  %p697_p1 = pnand %p696_p2, %p919_p6  ;;  %p703_p12 = scmp.lt.s32.totalorder %s701_s8, %s695_s5 }
  0x72   : > { %v262_v30 = vrot.slane %v212_v17, %v261_v22  ;;  %v272_v33 = vrot.slane %v212_v17, %v271_v26  ;;  %v282_v42 = vrot.slane %v212_v17, %v281_v34  ;;  %v292_v48 = vrot.slane %v212_v17, %v291_v43 }
  0x73   : > { %p698_p4 = pneg %p697_p1  ;;  %p704_p3 = por %p703_p12, %p702_p8 }
  0x74   : > { %598 = vset.pattern.permute.xlu1 %v774_v5  ;;  %599 = vset.pattern.permute.xlu0 %v775_v6 }
  0x75   : > { %256 = vperm.xlu1 %598, %v213_v2   ;;  %266 = vperm.xlu0 %599, %v213_v2   ;;  %p705_p7 = pnand %p704_p3, %p698_p4 }
  0x79   : > { %600 = vset.pattern.permute.xlu1 %v776_v8  ;;  %602 = vset.pattern.permute.xlu0 %v771_v1 }
  0x7a   : > { %276 = vperm.xlu1 %600, %v213_v2   ;;  %300 = vperm.xlu0 %602, %v214_v7  }
  0x7e   : > { %601 = vset.pattern.permute.xlu1 %v777_v9  ;;  %605 = vset.pattern.permute.xlu0 %v772_v3 }
  0x7f   : > { %286 = vperm.xlu1 %601, %v213_v2   ;;  %339 = vperm.xlu0 %605, %v214_v7  }
  0x83   : > { %603 = vset.pattern.permute.xlu1 %v773_v4  ;;  %608 = vset.pattern.permute.xlu0 %v776_v8 }
  0x84   : > { %313 = vperm.xlu1 %603, %v214_v7   ;;  %378 = vperm.xlu0 %608, %v214_v7  }
  0x88   : > { %604 = vset.pattern.permute.xlu1 %v770_v0 }
  0x89   : > { %326 = vperm.xlu1 %604, %v214_v7  }
  0x8d   : > { %606 = vset.pattern.permute.xlu1 %v774_v5 }
  0x8e   : > { %352 = vperm.xlu1 %606, %v214_v7  }
  0x92   : > { %607 = vset.pattern.permute.xlu1 %v775_v6 }
  0x93   : > { %365 = vperm.xlu1 %607, %v214_v7  }
  0xea   : > { %v237_v16 = vpop.permute.xlu1 %236  ;;  %v218_v18 = vpop.permute.xlu0 %217 }
  0xeb   : > { %v224_v27 = vmul.f32 %v223_v19, %v218_v18  ;;  %v243_v31 = vmul.f32 %v242_v23, %v237_v16 }
  0xef   : > { %v247_v24 = vpop.permute.xlu1 %246  ;;  %v227_v25 = vpop.permute.xlu0 %226 }
  0xf0   : > { %v233_v29 = vmul.f32 %v232_v21, %v227_v25  ;;  %v253_v35 = vmul.f32 %v252_v28, %v247_v24 }
  0xf2   : > { %v234_v32 = vadd.f32 %v233_v29, %v224_v27 }
  0xf4   : > { %v244_v36 = vadd.f32 %v243_v31, %v234_v32  ;;  %v257_v37 = vpop.permute.xlu1 %256  ;;  %v267_v38 = vpop.permute.xlu0 %266 }
  0xf5   : > { %v263_v39 = vmul.f32 %v262_v30, %v257_v37  ;;  %v273_v41 = vmul.f32 %v272_v33, %v267_v38 }
  0xf6   : > { %v254_v40 = vadd.f32 %v253_v35, %v244_v36 }
  0xf8   : > { %v264_v44 = vadd.f32 %v263_v39, %v254_v40 }
  0xf9   : > { %v277_v45 = vpop.permute.xlu1 %276  ;;  %v301_v53 = vpop.permute.xlu0 %300 }
  0xfa   : > { %v274_v46 = vadd.f32 %v273_v41, %v264_v44  ;;  %v283_v47 = vmul.f32 %v282_v42, %v277_v45 }
  0xfc   : > { %v284_v50 = vadd.f32 %v283_v47, %v274_v46 }
  0xfe   : > { %v287_v49 = vpop.permute.xlu1 %286  ;;  %v340_v5 = vpop.permute.xlu0 %339 }
  0xff   : > { %v293_v51 = vmul.f32 %v292_v48, %v287_v49 }
 0x101   : > { %v294_v52 = vadd.f32 %v293_v51, %v284_v50 }
 0x103   : > { %vm295_vm0 = vcmp.ge.f32.partialorder %v294_v52, 10.0  ;;  %v314_v59 = vpop.permute.xlu1 %313  ;;  %v379_v21 = vpop.permute.xlu0 %378 }
 0x104   : > { %v506_v55 = vsel %vm295_vm0, 1.0, %v778_v54 }
 0x105   : > { %v306_v56 = vrot.slane %v506_v55, %v222_v13 }
 0x107   : > { %v307_v57 = vmul.f32 %v306_v56, %v301_v53 }
 0x108   : > { %v327_v0 = vpop.permute.xlu1 %326 }
 0x109   : > { %v308_v58 = vadd.f32 %v307_v57, %v294_v52 }
 0x10b   : > { %vm309_vm1 = vcmp.ge.f32.partialorder %v308_v58, 10.0 }
 0x10c   : > { %v507_v60 = vsel %vm309_vm1, 1.0, %v778_v54 }
 0x10d   : > { %v319_v61 = vrot.slane %v507_v60, %v231_v14  ;;  %v353_v10 = vpop.permute.xlu1 %352 }
 0x10f   : > { %v320_v62 = vmul.f32 %v319_v61, %v314_v59 }
 0x111   : > { %v321_v63 = vadd.f32 %v320_v62, %v308_v58 }
 0x112   : > { %v366_v16 = vpop.permute.xlu1 %365 }
 0x113   : > { %vm322_vm2 = vcmp.ge.f32.partialorder %v321_v63, 10.0 }
 0x114   : > { %v508_v1 = vsel %vm322_vm2, 1.0, %v778_v54 }
 0x115   : > { %v332_v2 = vrot.slane %v508_v1, %v241_v15 }
 0x117   : > { %v333_v3 = vmul.f32 %v332_v2, %v327_v0 }
 0x119   : > { %v334_v4 = vadd.f32 %v333_v3, %v321_v63 }
 0x11b   : > { %vm335_vm3 = vcmp.ge.f32.partialorder %v334_v4, 10.0 }
 0x11c   : > { %v509_v6 = vsel %vm335_vm3, 1.0, %v778_v54 }
 0x11d   : > { %v345_v7 = vrot.slane %v509_v6, %v251_v20 }
 0x11f   : > { %v346_v8 = vmul.f32 %v345_v7, %v340_v5 }
 0x121   : > { %v347_v9 = vadd.f32 %v346_v8, %v334_v4 }
 0x123   : > { %vm348_vm4 = vcmp.ge.f32.partialorder %v347_v9, 10.0 }
 0x124   : > { %v510_v11 = vsel %vm348_vm4, 1.0, %v778_v54 }
 0x125   : > { %v358_v12 = vrot.slane %v510_v11, %v261_v22 }
 0x127   : > { %v359_v13 = vmul.f32 %v358_v12, %v353_v10 }
 0x129   : > { %v360_v14 = vadd.f32 %v359_v13, %v347_v9 }
 0x12b   : > { %vm361_vm5 = vcmp.ge.f32.partialorder %v360_v14, 10.0 }
 0x12c   : > { %v511_v17 = vsel %vm361_vm5, 1.0, %v778_v54 }
 0x12d   : > { %v371_v15 = vrot.slane %v511_v17, %v271_v26 }
 0x12f   : > { %v372_v18 = vmul.f32 %v371_v15, %v366_v16 }
 0x131   : > { %v373_v19 = vadd.f32 %v372_v18, %v360_v14 }
 0x133   : > { %vm374_vm6 = vcmp.ge.f32.partialorder %v373_v19, 10.0 }
 0x134   : > { %v512_v20 = vsel %vm374_vm6, 1.0, %v778_v54 }
 0x135   : > { %v384_v23 = vrot.slane %v512_v20, %v281_v34 }
 0x137   : > { %v385_v24 = vmul.f32 %v384_v23, %v379_v21 }
 0x139   : > { %v386_v22 = vadd.f32 %v385_v24, %v373_v19 }
 0x13b   : > { %vm387_vm7 = vcmp.ge.f32.partialorder %v386_v22, 10.0 }
 0x13c   : > { %v513_v25 = vsel %vm387_vm7, 1.0, %v778_v54 }
 0x13d   : > { %390 = vst [vmem:[%s210_s24] sm:$0xff] %v513_v25 }
 0x13e   : > { %708 = shalt.err (!%p705_p7)
}
 0x13f   : > { %s709_s9 = scalar_lea.hbm %s995_s22, 128  ;;  %s713_s17 = scalar_lea.hbm %s1042_s3, 256 }
 0x140   : > { %p710_p10 = scmp.ne.s32.totalorder %s995_s22, %s709_s9  ;;  %p714_p0 = scmp.lt.u32.totalorder %s995_s22, %s1042_s3 }
 0x141   : > { %p715_p11 = scmp.lt.u32.totalorder %s713_s17, %s709_s9  ;;  %p717_p2 = scmp.lt.u32.totalorder %s709_s9, %s995_s22 }
 0x142   : > { %p711_p13 = pnand %p710_p10, %p919_p6 }
 0x143   : > { %p716_p9 = por %p715_p11, %p714_p0 }
 0x144   : > { %p712_p5 = pneg %p711_p13 }
 0x145   : > { %p718_p1 = por %p717_p2, %p716_p9 }
 0x147   : > { %p719_p4 = pnand %p718_p1, %p712_p5 }
 0x149   : > { %722 = shalt.err (!%p719_p4)
}
 0x14a   : > { %528 = dma.vmem_to_hbm [thread:$0]  (%p919_p6), %s997_s21, 128, %s995_s22, %s392_s4  }
 0x14b PF: > { %s417_s30 = sand.u32 1, %s753_s12   ;;  %p1057_p8 = scmp.ne.s32.totalorder %s1047_s19, 0 }
 0x14c   : > { %p1058_p12 = scmp.ge.s32.totalorder %s765_s15, 2  ;;  %s418_s18 = scalar_lea.sflag [#allocation4], %s417_s30 }
 0x14e   : > { %p542_p3 = pnand %p1058_p12, %p1057_p8 }
 0x150   : > { %748 = dma.done.wait (!%p542_p3), %s418_s18, 128  }
 0x151   : > { %750 = vsyncadd (!%p542_p3), %s418_s18, 4294967168  ;;  %p17_p7 = scmp.ge.s32.totalorder %s856_s26, 4   ;;  %s1059_s12 = smov %s757_s13 }
 0x152   : > { %s1060_s13 = smov %s761_s14  ;;  %s1061_s14 = smov %s915_s25 }
 0x153   : > { %s1062_s15 = smov %s856_s26  ;;  %19 = sbr.rel (!%p17_p7) target bundleno = 6 (0x6), region = 85 }
 0x15a   :  { %423 = vsyncpa [#allocation3], 1 }
 0x15b   :  { %425 = vsyncpa [#allocation3 + $0x1], 1 }
 0x15c   :  { %426 = vsyncpa [#allocation6], 1 }
 0x15d   :  { %427 = vsyncpa [#allocation4], 1 }
 0x15e   :  { %429 = vsyncpa [#allocation4 + $0x1], 1 }

</bundles_post_ra>
